<compile_context>
chip_gen: v5e
topology: v5e:2x2
jax: 0.10.0
libtpu: 0.0.40
codegen_flags: <defaults>
</compile_context>

<pallas_src>
import functools

import jax
import jax.numpy as jnp
import numpy as np
from jax.experimental import pallas as pl
from jax.experimental.pallas import tpu as pltpu


def _nearest_idx(out_size, in_size):
    # PyTorch F.interpolate(mode='nearest', size=...): src = floor(dst*in/out)
    idx = (np.arange(out_size) * in_size) // out_size
    return np.minimum(idx, in_size - 1).astype(np.int64)


def _fused_kernel(x_ref, u_ref, b_ref, o_ref, *, k_pad):
    # x_ref: (N*Hx, Wx*Cin)   source images, batches stacked along sublanes
    # u_ref: (3, N*Hy, N*Hx)  block-diagonal 0/1 row selectors per vertical tap
    #                         (nearest H-upsample + H-pad folded in)
    # b_ref: (128, Wy*Cout)   [Bh(kh=0); Bh(kh=1); Bh(kh=2); bias row; zeros]
    # o_ref: (N*Hy, Wy*Cout)  lane-dense output block
    xv = x_ref[...]
    # Vertical taps: three tiny row-select matmuls (K = N*Hx).
    segs = [jnp.dot(u_ref[kh], xv, preferred_element_type=jnp.float32)
            for kh in range(3)]
    # All-ones pad block multiplies Bg's bias row -> the bias rides the MXU
    # accumulate; the lane concat makes the tap contraction one K=128 pass.
    segs.append(jnp.ones((o_ref.shape[0], k_pad), jnp.float32))
    xg = jnp.concatenate(segs, axis=-1)                       # (N*Hy, 128)
    o_ref[...] = jnp.dot(xg, b_ref[...],
                         preferred_element_type=jnp.float32).astype(o_ref.dtype)


@jax.jit
def better_upsampling_forward(x, y, weight, bias):
    """Matches better_upsampling.forward: nearest-resize x to y's spatial size,
    F.pad(..., (1,1,1,1)), conv3x3(padding=0) + bias.  NCHW in / NCHW out."""
    N, Cin, Hx, Wx = x.shape
    Hy, Wy = y.shape[2], y.shape[3]
    Cout = weight.shape[0]

    idx_h = _nearest_idx(Hy, Hx)
    idx_w = _nearest_idx(Wy, Wx)

    # ---- static 0/1 selection matrices (numpy at trace time, no XLA ops) ----
    # U[kh][n*Hy+ho, n*Hx+hx] = 1 iff padded row (ho+kh) of batch n is a real
    # row whose nearest source row is hx (padded rows 0 and Hy+1 are zeros).
    U = np.zeros((3, N * Hy, N * Hx), np.float32)
    for kh in range(3):
        for ho in range(Hy):
            p = ho + kh
            if 1 <= p <= Hy:
                for n in range(N):
                    U[kh, n * Hy + ho, n * Hx + idx_h[p - 1]] = 1.0

    # S[p, wx] = 1 iff padded column p is a real column nearest-mapping to wx.
    S = np.zeros((Wy + 2, Wx), np.float32)
    S[np.arange(1, Wy + 1), idx_w] = 1.0
    # Ssh[kw, wo, wx] = S[wo + kw, wx]
    Ssh = np.stack([S[kw:kw + Wy, :] for kw in range(3)], axis=0)

    # ---- Bg: W-upsample + W-pad + conv taps with kw summed out (one einsum) --
    # Bh[kh, wx, ci, wo, co] = sum_kw Ssh[kw, wo, wx] * W[co, ci, kh, kw]
    Bh = jnp.einsum('auw,ocha->hwcuo', jnp.asarray(Ssh),
                    weight.astype(jnp.float32))
    k_real = 3 * Wx * Cin
    k_tot = ((k_real + 1 + 127) // 128) * 128       # pad contraction to 128 lanes
    k_pad = k_tot - k_real
    bias_row = jnp.tile(bias.astype(jnp.float32), Wy).reshape(1, Wy * Cout)
    Bg = jnp.concatenate(
        [Bh.reshape(k_real, Wy * Cout),
         bias_row,                                   # matched by ones block in Xg
         jnp.zeros((k_pad - 1, Wy * Cout), jnp.float32)], axis=0)

    # Only the tiny *source* image gets an NCHW -> (w, ci)-lane transpose; all
    # output-sized data stays lane-dense until the final NCHW unpack.
    x2d = jnp.transpose(x, (0, 2, 3, 1)).reshape(N * Hx, Wx * Cin)

    out2d = pl.pallas_call(
        functools.partial(_fused_kernel, k_pad=k_pad),
        out_shape=jax.ShapeDtypeStruct((N * Hy, Wy * Cout), x.dtype),
        in_specs=[pl.BlockSpec(memory_space=pltpu.MemorySpace.VMEM)] * 3,
        out_specs=pl.BlockSpec(memory_space=pltpu.MemorySpace.VMEM),
    )(x2d, jnp.asarray(U), Bg)

    # (N*Hy, Wy*Cout) -> NCHW, undoing the lane-dense output packing.
    return jnp.transpose(out2d.reshape(N, Hy, Wy, Cout), (0, 3, 1, 2))


def _reference(x, y, weight, bias):
    """Pure-JAX reference matching PyTorch semantics exactly."""
    N, Cin, Hx, Wx = x.shape
    Hy, Wy = y.shape[2], y.shape[3]
    idx_h = _nearest_idx(Hy, Hx)
    idx_w = _nearest_idx(Wy, Wx)
    xu = x[:, :, idx_h, :][:, :, :, idx_w]                 # nearest resize
    xp = jnp.pad(xu, ((0, 0), (0, 0), (1, 1), (1, 1)))     # F.pad (1,1,1,1)
    out = jax.lax.conv_general_dilated(
        xp, weight, window_strides=(1, 1), padding="VALID",
        dimension_numbers=("NCHW", "OIHW", "NCHW"))
    return out + bias[None, :, None, None]


if __name__ == "__main__":
    # better_upsampling(in_ch=4, out_ch=8, scale_factor=2):
    # x (2,4,8,8) is resized to y's 16x16, padded, convolved -> (2,8,16,16).
    N, Cin, Cout, Hx, Wx, Hy, Wy = 2, 4, 8, 8, 8, 16, 16

    key = jax.random.PRNGKey(0)
    kx, ky, kwt, kb = jax.random.split(key, 4)
    x = jax.random.normal(kx, (N, Cin, Hx, Wx), dtype=jnp.float32)
    y = jax.random.normal(ky, (N, Cout, Hy, Wy), dtype=jnp.float32)
    weight = jax.random.normal(kwt, (Cout, Cin, 3, 3), dtype=jnp.float32) * 0.1
    bias = jax.random.normal(kb, (Cout,), dtype=jnp.float32) * 0.1

    out = better_upsampling_forward(x, y, weight, bias)
    out = jax.block_until_ready(out)

    ref = _reference(x, y, weight, bias)
    assert out.shape == (N, Cout, Hy, Wy)
    assert jnp.allclose(out, ref, atol=1e-4, rtol=1e-4), "mismatch vs reference"

    print("KERNEL_OK")
</pallas_src>

<mosaic_0001>
module attributes {stable_mosaic.version = 11 : i64} {
  func.func @_fused_kernel(%arg0: memref<16x32xf32, #tpu.memory_space<vmem>>, %arg1: memref<3x32x16xf32, #tpu.memory_space<vmem>>, %arg2: memref<128x128xf32, #tpu.memory_space<vmem>>, %arg3: memref<32x128xf32, #tpu.memory_space<vmem>>) attributes {dimension_semantics = [], scalar_prefetch = 0 : i64, scratch_operands = 0 : i64, tpu.core_type = #tpu.core_type<tc>} {
    %c0 = arith.constant 0 : index
    %c0_0 = arith.constant 0 : index
    %0 = vector.load %arg0[%c0, %c0_0] : memref<16x32xf32, #tpu.memory_space<vmem>>, vector<16x32xf32>
    %c0_1 = arith.constant 0 : index
    %c0_2 = arith.constant 0 : index
    %c0_3 = arith.constant 0 : index
    %1 = vector.load %arg1[%c0_1, %c0_2, %c0_3] : memref<3x32x16xf32, #tpu.memory_space<vmem>>, vector<1x32x16xf32>
    %2 = vector.shape_cast %1 : vector<1x32x16xf32> to vector<32x16xf32>
    %cst = arith.constant dense<0.000000e+00> : vector<32x32xf32>
    %3 = tpu.matmul %2, %0, %cst {dimension_numbers = #tpu.dot_dimension_numbers<[1], [0], [0], [1], [0, 0, 1, 1], [], []>} : vector<32x16xf32>, vector<16x32xf32>, vector<32x32xf32> -> vector<32x32xf32>
    %c1 = arith.constant 1 : index
    %c0_4 = arith.constant 0 : index
    %c0_5 = arith.constant 0 : index
    %4 = vector.load %arg1[%c1, %c0_4, %c0_5] : memref<3x32x16xf32, #tpu.memory_space<vmem>>, vector<1x32x16xf32>
    %5 = vector.shape_cast %4 : vector<1x32x16xf32> to vector<32x16xf32>
    %cst_6 = arith.constant dense<0.000000e+00> : vector<32x32xf32>
    %6 = tpu.matmul %5, %0, %cst_6 {dimension_numbers = #tpu.dot_dimension_numbers<[1], [0], [0], [1], [0, 0, 1, 1], [], []>} : vector<32x16xf32>, vector<16x32xf32>, vector<32x32xf32> -> vector<32x32xf32>
    %c2 = arith.constant 2 : index
    %c0_7 = arith.constant 0 : index
    %c0_8 = arith.constant 0 : index
    %7 = vector.load %arg1[%c2, %c0_7, %c0_8] : memref<3x32x16xf32, #tpu.memory_space<vmem>>, vector<1x32x16xf32>
    %8 = vector.shape_cast %7 : vector<1x32x16xf32> to vector<32x16xf32>
    %cst_9 = arith.constant dense<0.000000e+00> : vector<32x32xf32>
    %9 = tpu.matmul %8, %0, %cst_9 {dimension_numbers = #tpu.dot_dimension_numbers<[1], [0], [0], [1], [0, 0, 1, 1], [], []>} : vector<32x16xf32>, vector<16x32xf32>, vector<32x32xf32> -> vector<32x32xf32>
    %cst_10 = arith.constant 1.000000e+00 : f32
    %10 = vector.broadcast %cst_10 : f32 to vector<32x32xf32>
    %11 = tpu.concatenate %3, %6, %9, %10 in 1 : vector<32x32xf32>, vector<32x32xf32>, vector<32x32xf32>, vector<32x32xf32> -> vector<32x128xf32>
    %c0_11 = arith.constant 0 : index
    %c0_12 = arith.constant 0 : index
    %12 = vector.load %arg2[%c0_11, %c0_12] : memref<128x128xf32, #tpu.memory_space<vmem>>, vector<128x128xf32>
    %cst_13 = arith.constant dense<0.000000e+00> : vector<32x128xf32>
    %13 = tpu.matmul %11, %12, %cst_13 {dimension_numbers = #tpu.dot_dimension_numbers<[1], [0], [0], [1], [0, 0, 1, 1], [], []>} : vector<32x128xf32>, vector<128x128xf32>, vector<32x128xf32> -> vector<32x128xf32>
    %c0_14 = arith.constant 0 : index
    %c0_15 = arith.constant 0 : index
    %14 = vector.load %arg3[%c0_14, %c0_15] : memref<32x128xf32, #tpu.memory_space<vmem>>, vector<32x128xf32>
    tpu.vector_store %arg3[%c0_14, %c0_15], %13 {strides = array<i32>} : memref<32x128xf32, #tpu.memory_space<vmem>>, vector<32x128xf32>,
    return
  }
}

</mosaic_0001>

<bundles_post_ra>
// kernel: tile.8
= control target key start
LH: loop header
LB: loop body
LE: loop exit
PB: predicated region body
PF: predicated region fallthrough
CT: control target
= control target key end

     0   :  { %s28_s0 = inlined_call_operand.vmem [shape: f32[8], index: 0, kind: input, shape index: {}]   ;;  %s29_s1 = inlined_call_operand.vmem [shape: f32[16,8], index: 1, kind: output, shape index: {}]  }
   0x1   :  { %v4_v0 = vld [vmem:[%s28_s0] ss:$0 sm:$0xff] }
   0x2   :  { %5 = vst [vmem:[%s29_s1] sm:$0xff] %v4_v0 }
   0x3   :  { %8 = vst [vmem:[%s29_s1 + $0x8] sm:$0xff] %v4_v0 }

// kernel: tile.9
= control target key start
LH: loop header
LB: loop body
LE: loop exit
PB: predicated region body
PF: predicated region fallthrough
CT: control target
= control target key end

     0   :  { %s131_s10 = smov 120   ;;  %s132_s11 = smov 104   ;;  %vm3_vm0 = vcmask 64512   ;;  %vm9_vm1 = vcmask 1048512   ;;  %vm15_vm2 = vcmask 982912   ;;  %vm21_vm3 = vcmask 917312   ;;  %s207_s0 = inlined_call_operand.vmem [shape: f32[16,8], index: 0, kind: input, shape index: {}]   ;;  %s208_s1 = inlined_call_operand.vmem [shape: f32[1,128], index: 1, kind: output, shape index: {}]  }
   0x1   :  { %v101_v0 = vld [vmem:[%s207_s0 + $0xf] sm:$0x1]   ;;  %v103_v1 = vld [vmem:[%s207_s0 + $0xd] sm:$0x1]   ;;  %v105_v2 = vld [vmem:[%s207_s0 + $0xb] sm:$0x1]  }
   0x2   :  { %7 = vrot.lane.b32.xlu0 %v101_v0, %s131_s10  ;;  %19 = vrot.lane.b32.xlu1 %v103_v1, %s132_s11  ;;  %s133_s14 = smov 88   ;;  %v102_v3 = vld [vmem:[%s207_s0 + $0xe] sm:$0x1]   ;;  %v104_v4 = vld [vmem:[%s207_s0 + $0xc] sm:$0x1]   ;;  %s134_s19 = smov 112  }
   0x3   :  { %31 = vrot.lane.b32.xlu2 %v105_v2, %s133_s14  ;;  %s135_s20 = smov 96   ;;  %v106_v5 = vld [vmem:[%s207_s0 + $0xa] sm:$0x1]   ;;  %s136_s23 = smov 80   ;;  %v107_v6 = vld [vmem:[%s207_s0 + $0x9] sm:$0x1]  }
   0x4   :  { %v108_v7 = vld [vmem:[%s207_s0 + $0x8] sm:$0x1]   ;;  %s137_s28 = smov 72   ;;  %s138_s29 = smov 64   ;;  %v109_v8 = vld [vmem:[%s207_s0 + $0x7] sm:$0x1]  }
   0x5   :  { %s139_s3 = smov 56   ;;  %v110_v9 = vld [vmem:[%s207_s0 + $0x6] sm:$0x1]   ;;  %v111_v10 = vld [vmem:[%s207_s0 + $0x5] sm:$0x1]   ;;  %s140_s8 = smov 48  }
   0x6   :  { %s141_s9 = smov 40   ;;  %v112_v11 = vld [vmem:[%s207_s0 + $0x4] sm:$0x1]   ;;  %s142_s12 = smov 32   ;;  %v113_v12 = vld [vmem:[%s207_s0 + $0x3] sm:$0x1]  }
   0x7   :  { %v114_v13 = vld [vmem:[%s207_s0 + $0x2] sm:$0x1]   ;;  %s143_s17 = smov 24   ;;  %s144_s18 = smov 16   ;;  %v115_v14 = vld [vmem:[%s207_s0 + $0x1] sm:$0x1]  }
   0x8   :  { %s145_s21 = smov 8   ;;  %v2_v15 = vld [vmem:[%s207_s0] sm:$0x1]   ;;  %vm27_vm4 = vcmask 851712   ;;  %vm33_vm5 = vcmask 786112   ;;  %vm39_vm6 = vcmask 720512  }
   0x9   :  { %4 = vst.msk [vmem:[#allocation0] sm:$0x1] %vm3_vm0, %v2_v15   ;;  %vm45_vm7 = vcmask 654912   ;;  %vm51_vm8 = vcmask 589312   ;;  %vm57_vm9 = vcmask 523712   ;;  %vm63_vm10 = vcmask 458112  }
   0xa   :  { %13 = vrot.lane.b32.xlu0 %v102_v3, %s134_s19  ;;  %25 = vrot.lane.b32.xlu1 %v104_v4, %s135_s20  ;;  %vm69_vm11 = vcmask 392512   ;;  %vm75_vm12 = vcmask 326912   ;;  %vm81_vm13 = vcmask 261312   ;;  %vm87_vm14 = vcmask 195712  }
   0xb   :  { %37 = vrot.lane.b32.xlu2 %v106_v5, %s136_s23  ;;  %vm93_vm15 = vcmask 130112  }
  0x12   :  { %43 = vrot.lane.b32.xlu0 %v107_v6, %s137_s28  ;;  %49 = vrot.lane.b32.xlu1 %v108_v7, %s138_s29 }
  0x13   :  { %55 = vrot.lane.b32.xlu2 %v109_v8, %s139_s3 }
  0x1a   :  { %61 = vrot.lane.b32.xlu0 %v110_v9, %s140_s8  ;;  %67 = vrot.lane.b32.xlu1 %v111_v10, %s141_s9 }
  0x1b   :  { %73 = vrot.lane.b32.xlu2 %v112_v11, %s142_s12 }
  0x22   :  { %79 = vrot.lane.b32.xlu0 %v113_v12, %s143_s17  ;;  %85 = vrot.lane.b32.xlu1 %v114_v13, %s144_s18 }
  0x23   :  { %91 = vrot.lane.b32.xlu2 %v115_v14, %s145_s21 }
  0x5d   :  { %v32_v16 = vpop.permute.xlu2 %31  }
  0x65   :  { %v38_v17 = vpop.permute.xlu2 %37  }
  0x6d   :  { %v56_v18 = vpop.permute.xlu2 %55  }
  0x74   :  { %v8_v19 = vpop.permute.xlu0 %7   ;;  %v20_v20 = vpop.permute.xlu1 %19  }
  0x75   :  { %10 = vst.msk [vmem:[#allocation0] sm:$0x1] %vm9_vm1, %v8_v19   ;;  %v74_v21 = vpop.permute.xlu2 %73  }
  0x7c   :  { %v14_v22 = vpop.permute.xlu0 %13   ;;  %v26_v23 = vpop.permute.xlu1 %25  }
  0x7d   :  { %16 = vst.msk [vmem:[#allocation0] sm:$0x1] %vm15_vm2, %v14_v22   ;;  %v92_v24 = vpop.permute.xlu2 %91  }
  0x7e   :  { %22 = vst.msk [vmem:[#allocation0] sm:$0x1] %vm21_vm3, %v20_v20  }
  0x7f   :  { %28 = vst.msk [vmem:[#allocation0] sm:$0x1] %vm27_vm4, %v26_v23  }
  0x80   :  { %34 = vst.msk [vmem:[#allocation0] sm:$0x1] %vm33_vm5, %v32_v16  }
  0x81   :  { %40 = vst.msk [vmem:[#allocation0] sm:$0x1] %vm39_vm6, %v38_v17  }
  0x84   :  { %v44_v25 = vpop.permute.xlu0 %43   ;;  %v50_v26 = vpop.permute.xlu1 %49  }
  0x85   :  { %46 = vst.msk [vmem:[#allocation0] sm:$0x1] %vm45_vm7, %v44_v25  }
  0x86   :  { %52 = vst.msk [vmem:[#allocation0] sm:$0x1] %vm51_vm8, %v50_v26  }
  0x87   :  { %58 = vst.msk [vmem:[#allocation0] sm:$0x1] %vm57_vm9, %v56_v18  }
  0x8c   :  { %v62_v27 = vpop.permute.xlu0 %61   ;;  %v68_v28 = vpop.permute.xlu1 %67  }
  0x8d   :  { %64 = vst.msk [vmem:[#allocation0] sm:$0x1] %vm63_vm10, %v62_v27  }
  0x8e   :  { %70 = vst.msk [vmem:[#allocation0] sm:$0x1] %vm69_vm11, %v68_v28  }
  0x8f   :  { %76 = vst.msk [vmem:[#allocation0] sm:$0x1] %vm75_vm12, %v74_v21  }
  0x94   :  { %v80_v29 = vpop.permute.xlu0 %79   ;;  %v86_v30 = vpop.permute.xlu1 %85  }
  0x95   :  { %82 = vst.msk [vmem:[#allocation0] sm:$0x1] %vm81_vm13, %v80_v29  }
  0x96   :  { %88 = vst.msk [vmem:[#allocation0] sm:$0x1] %vm87_vm14, %v86_v30  }
  0x97   :  { %94 = vst.msk [vmem:[#allocation0] sm:$0x1] %vm93_vm15, %v92_v24  }
  0x9e   :  { %v97_v31 = vld [vmem:[#allocation0] sm:$0x1] }
  0x9f   :  { %100 = vst [vmem:[%s208_s1] sm:$0x1] %v97_v31 }

// kernel: better_upsampling_forward.1
= control target key start
LH: loop header
LB: loop body
LE: loop exit
PB: predicated region body
PF: predicated region fallthrough
CT: control target
= control target key end

     0   :  { %vm20_vm0 = vcmask 130048   ;;  %s344_s21 = smov 32   ;;  %s345_s29 = smov 64   ;;  %vm186_vm1 = vcmask 261120   ;;  %vm191_vm2 = vcmask 523264   ;;  %vm196_vm3 = vcmask 785408   ;;  %s494_s0 = inlined_call_operand.vmem [shape: f32[16,32], index: 0, kind: input, shape index: {}]   ;;  %s495_s1 = inlined_call_operand.vmem [shape: f32[3,32,16], index: 1, kind: input, shape index: {}]   ;;  %s496_s2 = inlined_call_operand.vmem [shape: f32[128,128], index: 2, kind: input, shape index: {}]   ;;  %s497_s3 = inlined_call_operand.vmem [shape: f32[32,128], index: 3, kind: output, shape index: {}]  }
   0x1   :  { %v15_v0 = vld [vmem:[%s494_s0 + $0x8] sm:$0xff]  ;;  %v14_v1 = vld [vmem:[%s494_s0] sm:$0xff]  ;;  %v260_v7 = vld [vmem:[%s495_s1 + $0x30] sm:$0xff] }
   0x2   :  { %93 = vmatpush.msra.mxu1 %v15_v0  ;;  %139 = vmatpush.msra.mxu2 %v15_v0  ;;  %v258_v2 = vld [vmem:[%s495_s1 + $0x20] sm:$0xff]  ;;  %v259_v5 = vld [vmem:[%s495_s1 + $0x28] sm:$0xff]  ;;  %v268_v8 = vld [vmem:[%s495_s1 + $0x50] sm:$0xff] }
   0x3   :  { %v266_v3 = vld [vmem:[%s495_s1 + $0x40] sm:$0xff]  ;;  %47 = vmatpush.msra.mxu0 %v15_v0  ;;  %v267_v6 = vld [vmem:[%s495_s1 + $0x48] sm:$0xff]  ;;  %v261_v9 = vld [vmem:[%s495_s1 + $0x38] sm:$0xff] }
   0x4   :  { %94 = vmatpush.msra.mxu1 %v14_v1  ;;  %140 = vmatpush.msra.mxu2 %v14_v1  ;;  %v16_v4 = vld [vmem:[%s495_s1] sm:$0xff]  ;;  %v269_v10 = vld [vmem:[%s495_s1 + $0x58] sm:$0xff]  ;;  %v17_v11 = vld [vmem:[%s495_s1 + $0x8] sm:$0xff] }
   0x5   :  { %262 = vmatmul.msk.f32.vlgmr.msra.gmra.mxu1 %vm20_vm0, %v258_v2  ;;  %270 = vmatmul.msk.f32.vlgmr.msra.gmra.mxu2 %vm20_vm0, %v266_v3  ;;  %v18_v12 = vld [vmem:[%s495_s1 + $0x10] sm:$0xff]  ;;  %v19_v13 = vld [vmem:[%s495_s1 + $0x18] sm:$0xff]  ;;  %v214_v17 = vld [vmem:[%s496_s2 + $0x68] sm:$0xff] }
   0x6   :  { %48 = vmatpush.msra.mxu0 %v14_v1  ;;  %v216_v15 = vld [vmem:[%s496_s2 + $0x78] sm:$0xff]  ;;  %v215_v16 = vld [vmem:[%s496_s2 + $0x70] sm:$0xff]  ;;  %v213_v19 = vld [vmem:[%s496_s2 + $0x60] sm:$0xff] }
   0x7   :  { %254 = vmatmul.msk.f32.vlgmr.msra.gmra.mxu0 %vm20_vm0, %v16_v4  ;;  %274 = vmatpush.msrb.mxu1 %v216_v15  ;;  %v212_v22 = vld [vmem:[%s496_s2 + $0x58] sm:$0xff]  ;;  %v211_v23 = vld [vmem:[%s496_s2 + $0x50] sm:$0xff]  ;;  %v210_v24 = vld [vmem:[%s496_s2 + $0x48] sm:$0xff] }
   0x8   :  { %217 = vmatpush.msrb.mxu0 %v216_v15  ;;  %275 = vmatpush.msrb.mxu2 %v216_v15  ;;  %v209_v26 = vld [vmem:[%s496_s2 + $0x40] sm:$0xff]  ;;  %v208_v29 = vld [vmem:[%s496_s2 + $0x38] sm:$0xff]  ;;  %v207_v30 = vld [vmem:[%s496_s2 + $0x30] sm:$0xff] }
   0x9   :  { %276 = vmatpush.msra.mxu3 %v216_v15  ;;  %277 = vmatpush.msrb.mxu1 %v215_v16  ;;  %v206_v36 = vld [vmem:[%s496_s2 + $0x28] sm:$0xff]  ;;  %v205_v37 = vld [vmem:[%s496_s2 + $0x20] sm:$0xff]  ;;  %v204_v38 = vld [vmem:[%s496_s2 + $0x18] sm:$0xff] }
   0xa   :  { %218 = vmatpush.msrb.mxu0 %v215_v16  ;;  %278 = vmatpush.msrb.mxu2 %v215_v16  ;;  %v203_v39 = vld [vmem:[%s496_s2 + $0x10] sm:$0xff]  ;;  %v202_v40 = vld [vmem:[%s496_s2 + $0x8] sm:$0xff]  ;;  %v201_v41 = vld [vmem:[%s496_s2] sm:$0xff] }
   0xb   :  { %279 = vmatpush.msra.mxu3 %v215_v16  ;;  %280 = vmatpush.msrb.mxu1 %v214_v17 }
   0xc   :  { %219 = vmatpush.msrb.mxu0 %v214_v17  ;;  %281 = vmatpush.msrb.mxu2 %v214_v17 }
   0xd   :  { %263 = vmatmul.msk.f32.gmra.mxu1 %vm20_vm0, %v259_v5  ;;  %271 = vmatmul.msk.f32.gmra.mxu2 %vm20_vm0, %v267_v6 }
   0xe   :  { %282 = vmatpush.msra.mxu3 %v214_v17  ;;  %220 = vmatpush.msrb.mxu0 %v213_v19 }
   0xf   :  { %255 = vmatmul.msk.f32.gmra.mxu0 %vm20_vm0, %v17_v11  ;;  %283 = vmatpush.msrb.mxu1 %v213_v19 }
  0x10   :  { %284 = vmatpush.msrb.mxu2 %v213_v19  ;;  %221 = vmatpush.msrb.mxu0 %v212_v22 }
  0x11   :  { %286 = vmatpush.msrb.mxu1 %v212_v22  ;;  %285 = vmatpush.msra.mxu3 %v213_v19 }
  0x12   :  { %287 = vmatpush.msrb.mxu2 %v212_v22  ;;  %222 = vmatpush.msrb.mxu0 %v211_v23 }
  0x13   :  { %289 = vmatpush.msrb.mxu1 %v211_v23  ;;  %288 = vmatpush.msra.mxu3 %v212_v22 }
  0x14   :  { %290 = vmatpush.msrb.mxu2 %v211_v23  ;;  %223 = vmatpush.msrb.mxu0 %v210_v24 }
  0x15   :  { %264 = vmatmul.msk.f32.gmra.mxu1 %vm20_vm0, %v260_v7  ;;  %272 = vmatmul.msk.f32.gmra.mxu2 %vm20_vm0, %v268_v8 }
  0x16   :  { %292 = vmatpush.msrb.mxu1 %v210_v24  ;;  %291 = vmatpush.msra.mxu3 %v211_v23 }
  0x17   :  { %256 = vmatmul.msk.f32.gmra.mxu0 %vm20_vm0, %v18_v12  ;;  %293 = vmatpush.msrb.mxu2 %v210_v24 }
  0x18   :  { %224 = vmatpush.msrb.mxu0 %v209_v26  ;;  %295 = vmatpush.msrb.mxu1 %v209_v26 }
  0x19   :  { %294 = vmatpush.msra.mxu3 %v210_v24  ;;  %296 = vmatpush.msrb.mxu2 %v209_v26 }
  0x1a   :  { %225 = vmatpush.msrb.mxu0 %v208_v29  ;;  %298 = vmatpush.msrb.mxu1 %v208_v29 }
  0x1b   :  { %297 = vmatpush.msra.mxu3 %v209_v26  ;;  %299 = vmatpush.msrb.mxu2 %v208_v29 }
  0x1c   :  { %301 = vmatpush.msrb.mxu1 %v207_v30  ;;  %226 = vmatpush.msrb.mxu0 %v207_v30 }
  0x1d   :  { %265 = vmatmul.msk.f32.gmra.mxu1 %vm20_vm0, %v261_v9  ;;  %273 = vmatmul.msk.f32.gmra.mxu2 %vm20_vm0, %v269_v10 }
  0x1e   :  { %300 = vmatpush.msra.mxu3 %v208_v29  ;;  %302 = vmatpush.msrb.mxu2 %v207_v30 }
  0x1f   :  { %257 = vmatmul.msk.f32.gmra.mxu0 %vm20_vm0, %v19_v13  ;;  %304 = vmatpush.msrb.mxu1 %v206_v36 }
  0x20   :  { %303 = vmatpush.msra.mxu3 %v207_v30  ;;  %227 = vmatpush.msrb.mxu0 %v206_v36 }
  0x21   :  { %305 = vmatpush.msrb.mxu2 %v206_v36  ;;  %307 = vmatpush.msrb.mxu1 %v205_v37 }
  0x22   :  { %306 = vmatpush.msra.mxu3 %v206_v36  ;;  %228 = vmatpush.msrb.mxu0 %v205_v37 }
  0x23   :  { %308 = vmatpush.msrb.mxu2 %v205_v37  ;;  %310 = vmatpush.msrb.mxu1 %v204_v38 }
  0x24   :  { %309 = vmatpush.msra.mxu3 %v205_v37  ;;  %229 = vmatpush.msrb.mxu0 %v204_v38 }
  0x25   :  { %311 = vmatpush.msrb.mxu2 %v204_v38  ;;  %313 = vmatpush.msrb.mxu1 %v203_v39 }
  0x26   :  { %312 = vmatpush.msra.mxu3 %v204_v38  ;;  %230 = vmatpush.msrb.mxu0 %v203_v39 }
  0x27   :  { %314 = vmatpush.msrb.mxu2 %v203_v39  ;;  %316 = vmatpush.msrb.mxu1 %v202_v40 }
  0x28   :  { %315 = vmatpush.msra.mxu3 %v203_v39  ;;  %231 = vmatpush.msrb.mxu0 %v202_v40 }
  0x29   :  { %317 = vmatpush.msrb.mxu2 %v202_v40  ;;  %319 = vmatpush.msrb.mxu1 %v201_v41 }
  0x2a   :  { %318 = vmatpush.msra.mxu3 %v202_v40  ;;  %232 = vmatpush.msrb.mxu0 %v201_v41 }
  0x2b   :  { %320 = vmatpush.msrb.mxu2 %v201_v41 }
  0x2c   :  { %321 = vmatpush.msra.mxu3 %v201_v41 }
  0x82   :  { %v96_v14 = vpop.f32.mrf.mxu1 }
  0x84   :  { %v50_v42 = vpop.f32.mrf.mxu0 }
  0x88   :  { %v142_v18 = vpop.f32.mrf.mxu2 }
  0x8a   :  { %v99_v20 = vpop.f32.mrf.mxu1 }
  0x8b   :  { %v334_v21 = vpack.i.bf16 %v99_v20, %v96_v14 }
  0x8c   :  { %v53_v44 = vpop.f32.mrf.mxu0 }
  0x8d   :  { %335 = vrot.lane.b32.xlu1 %v334_v21, %s344_s21 }
  0x90   :  { %v145_v25 = vpop.f32.mrf.mxu2 }
  0x91   :  { %v339_v28 = vpack.i.bf16 %v145_v25, %v142_v18 }
  0x92   :  { %v102_v27 = vpop.f32.mrf.mxu1 }
  0x94   :  { %v56_v56 = vpop.f32.mrf.mxu0 }
  0x95   :  { %340 = vrot.lane.b32.xlu1 %v339_v28, %s345_s29 }
  0x98   :  { %v148_v31 = vpop.f32.mrf.mxu2 }
  0x9a   :  { %v105_v32 = vpop.f32.mrf.mxu1 }
  0x9b   :  { %v324_v33 = vpack.i.bf16 %v105_v32, %v102_v27 }
  0x9c   :  { %v59_v60 = vpop.f32.mrf.mxu0 }
  0x9d   :  { %325 = vrot.lane.b32.xlu0 %v324_v33, %s344_s21 }
  0xa0   :  { %v151_v34 = vpop.f32.mrf.mxu2 }
  0xa1   :  { %v329_v35 = vpack.i.bf16 %v151_v34, %v148_v31 }
  0xa5   :  { %330 = vrot.lane.b32.xlu0 %v329_v35, %s345_s29 }
  0xff   :  { %v336_v43 = vpop.permute.xlu1 %335 }
 0x100   :  { %v338_v45 = vunpack.i.h.bf16 %v336_v43  ;;  %v337_v46 = vunpack.i.l.bf16 %v336_v43 }
 0x102   :  { %v188_v50 = vsel %vm186_vm1, %v53_v44, %v338_v45  ;;  %v187_v51 = vsel %vm186_vm1, %v50_v42, %v337_v46 }
 0x107   :  { %v341_v47 = vpop.permute.xlu1 %340 }
 0x108   :  { %v343_v48 = vunpack.i.h.bf16 %v341_v47  ;;  %v342_v49 = vunpack.i.l.bf16 %v341_v47 }
 0x10a   :  { %v192_v52 = vsel %vm191_vm2, %v187_v51, %v342_v49  ;;  %v193_v53 = vsel %vm191_vm2, %v188_v50, %v343_v48 }
 0x10b   :  { %v197_v54 = vsel %vm196_vm3, %v192_v52, 1.0  ;;  %v198_v55 = vsel %vm196_vm3, %v193_v53, 1.0 }
 0x10c   :  { %233 = vmatmul.f32.vlgmr.msrb.gmra.mxu0 %v197_v54  ;;  %236 = vmatmul.f32.vlgmr.msrb.gmra.mxu1 %v198_v55 }
 0x10f   :  { %v326_v57 = vpop.permute.xlu0 %325 }
 0x110   :  { %v328_v58 = vunpack.i.h.bf16 %v326_v57  ;;  %v327_v59 = vunpack.i.l.bf16 %v326_v57 }
 0x112   :  { %v190_v0 = vsel %vm186_vm1, %v59_v60, %v328_v58  ;;  %v189_v1 = vsel %vm186_vm1, %v56_v56, %v327_v59 }
 0x117   :  { %v331_v61 = vpop.permute.xlu0 %330 }
 0x118   :  { %v333_v62 = vunpack.i.h.bf16 %v331_v61  ;;  %v332_v63 = vunpack.i.l.bf16 %v331_v61 }
 0x11a   :  { %v194_v2 = vsel %vm191_vm2, %v189_v1, %v332_v63  ;;  %v195_v3 = vsel %vm191_vm2, %v190_v0, %v333_v62 }
 0x11b   :  { %v199_v4 = vsel %vm196_vm3, %v194_v2, 1.0  ;;  %v200_v5 = vsel %vm196_vm3, %v195_v3, 1.0 }
 0x11c   :  { %239 = vmatmul.f32.vlgmr.msrb.gmra.mxu2 %v199_v4  ;;  %242 = vmatmul.f32.vlgmr.msra.gmra.mxu3 %v200_v5 }
 0x189   :  { %v234_v6 = vpop.f32.mrf.mxu0  ;;  %v237_v7 = vpop.f32.mrf.mxu1 }
 0x18a   :  { %246 = vst [vmem:[%s497_s3] sm:$0xff] %v234_v6 }
 0x18b   :  { %247 = vst [vmem:[%s497_s3 + $0x8] sm:$0xff] %v237_v7 }
 0x19f   :  { %v240_v8 = vpop.f32.mrf.mxu2  ;;  %v243_v9 = vpop.f32.mrf.mxu3 }
 0x1a0   :  { %248 = vst [vmem:[%s497_s3 + $0x10] sm:$0xff] %v240_v8 }
 0x1a1   :  { %249 = vst [vmem:[%s497_s3 + $0x18] sm:$0xff] %v243_v9 }

</bundles_post_ra>
